<compile_context>
chip_gen: v6e
topology: v6e:2x2x1
jax: 0.10.0
libtpu: 0.0.40
codegen_flags: <defaults>
</compile_context>

<pallas_src>
import functools

import jax
import jax.numpy as jnp
from jax.experimental import pallas as pl
from jax.experimental.pallas import tpu as pltpu


def _round_up(x: int, m: int) -> int:
    return ((x + m - 1) // m) * m


def _pick_tile(dim: int, align: int, candidates=(512, 256, 128)) -> int:
    """Pick a tile size minimizing zero padding; use a single full (aligned)
    tile when the whole dimension fits inside the largest candidate."""
    dim_aligned = _round_up(dim, align)
    if dim_aligned <= max(candidates):
        return dim_aligned
    best, best_pad = None, None
    for c in candidates:
        pad = _round_up(dim, c) - dim
        if best is None or pad < best_pad or (pad == best_pad and c > best):
            best, best_pad = c, pad
    return best


def _pick_tk(in_f: int, tn: int, *, tm_budget: int = 512,
             budget_bytes: int = 40 * 2**20) -> int:
    """Largest 128-multiple K tile that keeps double-buffered inputs + resident
    output inside a per-generation-safe VMEM budget; prefers full-K residency
    (no K grid axis) when it fits, otherwise minimizes K padding waste."""
    kp_full = _round_up(in_f, 128)
    fixed = 4 * (tm_budget * tn + 2 * tn)            # resident out + 2x bias
    per_k = 4 * 2 * (tm_budget + tn)                 # double-buffered x and W
    tk_cap = max(128, ((budget_bytes - fixed) // per_k) // 128 * 128)
    tk_cap = min(tk_cap, kp_full)
    if tk_cap >= kp_full:
        return kp_full
    best, best_pad = None, None
    tk = 128
    while tk <= tk_cap:
        pad = _round_up(in_f, tk) - in_f
        if best is None or pad <= best_pad:
            best, best_pad = tk, pad
        tk += 128
    return best


def linear_kernel(x_ref, w_ref, b_ref, o_ref):
    """One (i, j, k) grid step of y = x @ W_t + b (W_t already (in, out)).

    x_ref: (tm, tk) activations      w_ref: (tk, tn) pre-transposed weight
    b_ref: (1, tn)  bias             o_ref: (tm, tn) f32 output, k-resident
    """
    k = pl.program_id(2)
    partial = jnp.dot(x_ref[...], w_ref[...], preferred_element_type=jnp.float32)

    @pl.when(k == 0)
    def _first():
        # Fold zero-init and the (exactly-once) bias add into the first K step.
        o_ref[...] = partial + b_ref[...]

    @pl.when(k != 0)
    def _accumulate():
        o_ref[...] += partial


def init_simple_nn(weight, bias, *, tn=None, tk=None):
    """One-time parameter setup (outside the per-call path): pick N/K tiles,
    transpose W to (in_features, out_features), zero-pad W and b."""
    out_f, in_f = weight.shape
    tn = int(tn) if tn is not None else _pick_tile(out_f, 128)
    tk = int(tk) if tk is not None else _pick_tk(in_f, tn)
    Np = _round_up(out_f, tn)
    Kp = _round_up(in_f, tk)
    # One-time HBM-side transpose + pad, amortized over all forward calls.
    w_t = jnp.pad(weight.T, ((0, Kp - in_f), (0, Np - out_f)))       # (Kp, Np)
    b_p = jnp.pad(bias, (0, Np - out_f)).reshape(1, Np)              # (1, Np)
    return {"w_t": w_t, "b_p": b_p, "in_features": int(in_f),
            "out_features": int(out_f), "tn": tn, "tk": tk}


@functools.partial(jax.jit, static_argnames=("tm", "tn", "tk", "out_f"))
def _linear_pallas(x, w_t, b_p, *, tm, tn, tk, out_f):
    B, in_f = x.shape
    Kp, Np = w_t.shape
    Mp = _round_up(B, tm)
    # Only x is padded per call; zero K-padding is exact for the dot.
    x_p = jnp.pad(x, ((0, Mp - B), (0, Kp - in_f)))

    grid = (Mp // tm, Np // tn, Kp // tk)

    # Residency: double-buffered x & W tiles + resident f32 out tile + bias.
    resid_bytes = 4 * (2 * tm * tk + 2 * tk * tn + tm * tn + 2 * tn)
    vmem_limit = int(min(48 * 2**20, max(32 * 2**20, resid_bytes + (8 << 20))))

    flops = 2 * Mp * Np * Kp
    bytes_accessed = 4 * (Mp * Kp * (Np // tn) + Kp * Np * (Mp // tm)
                          + Mp * Np + Np)

    y_p = pl.pallas_call(
        linear_kernel,
        out_shape=jax.ShapeDtypeStruct((Mp, Np), jnp.float32),
        grid_spec=pltpu.PrefetchScalarGridSpec(
            num_scalar_prefetch=0,
            grid=grid,
            in_specs=[
                pl.BlockSpec((tm, tk), lambda i, j, k: (i, k)),   # x
                pl.BlockSpec((tk, tn), lambda i, j, k: (k, j)),   # W^T (in, out)
                pl.BlockSpec((1, tn), lambda i, j, k: (0, j)),    # bias
            ],
            out_specs=pl.BlockSpec((tm, tn), lambda i, j, k: (i, j)),
        ),
        compiler_params=pltpu.CompilerParams(
            dimension_semantics=("parallel", "parallel", "arbitrary"),
            vmem_limit_bytes=vmem_limit,
        ),
        cost_estimate=pl.CostEstimate(
            flops=flops, transcendentals=0, bytes_accessed=bytes_accessed),
    )(x_p, w_t, b_p)

    return y_p[:B, :out_f]


def simple_nn_forward(x, params, *, tm=None):
    """y = x @ weight.T + bias (torch.nn.Linear semantics) via Pallas."""
    assert x.ndim == 2 and x.shape[1] == params["in_features"]
    assert x.dtype == jnp.float32, "kernel accumulates directly in f32 output"
    B = x.shape[0]
    tm = int(tm) if tm is not None else _pick_tile(B, 8)
    tn = params["tn"]
    # v7x megacore: prefer >= 2 parallel grid steps when the M axis has only 1.
    Mp = _round_up(B, tm)
    Np = params["w_t"].shape[1]
    if (Mp // tm) * (Np // tn) < 2 and tn % 256 == 0:
        tn //= 2
    return _linear_pallas(x, params["w_t"], params["b_p"],
                          tm=tm, tn=tn, tk=params["tk"],
                          out_f=params["out_features"])


if __name__ == "__main__":
    # --- Module spec: SimpleNN(input_size=2, output_size=4), X=[[1,1],[2,2],[3,3]]
    input_size, output_size = 2, 4
    key = jax.random.PRNGKey(0)
    kw, kb = jax.random.split(key)
    bound = 1.0 / (input_size ** 0.5)
    weight = jax.random.uniform(kw, (output_size, input_size), jnp.float32,
                                -bound, bound)
    bias = jax.random.uniform(kb, (output_size,), jnp.float32, -bound, bound)

    params = init_simple_nn(weight, bias)
    x = jnp.array([[1.0, 1.0], [2.0, 2.0], [3.0, 3.0]], dtype=jnp.float32)

    y = simple_nn_forward(x, params)
    jax.block_until_ready(y)
    y_ref = x @ weight.T + bias
    assert y.shape == y_ref.shape, "shape mismatch vs reference"
    assert jnp.allclose(y, y_ref, atol=1e-5), "mismatch vs reference"

    # --- Secondary check: exercise multi-tile grid (K accumulation + parallel
    # N axis + M padding) at still-small shapes with explicit small tiles.
    k2w, k2b, k2x = jax.random.split(jax.random.PRNGKey(0), 3)
    in2, out2, b2 = 384, 256, 13
    w2 = jax.random.uniform(k2w, (out2, in2), jnp.float32, -0.05, 0.05)
    bi2 = jax.random.uniform(k2b, (out2,), jnp.float32, -0.05, 0.05)
    x2 = jax.random.normal(k2x, (b2, in2), jnp.float32)
    params2 = init_simple_nn(w2, bi2, tn=128, tk=128)   # grid = (1, 2, 3)
    y2 = simple_nn_forward(x2, params2)
    jax.block_until_ready(y2)
    y2_ref = x2 @ w2.T + bi2
    assert jnp.allclose(y2, y2_ref, atol=1e-4), "mismatch vs reference (tiled)"

    print("KERNEL_OK")
</pallas_src>

<mosaic_0001>
module attributes {stable_mosaic.version = 11 : i64} {
  func.func @linear_kernel(%arg0: i32, %arg1: i32, %arg2: i32, %arg3: memref<8x128xf32, #tpu.memory_space<vmem>>, %arg4: memref<128x128xf32, #tpu.memory_space<vmem>>, %arg5: memref<1x128xf32, #tpu.memory_space<vmem>>, %arg6: memref<8x128xf32, #tpu.memory_space<vmem>>) attributes {dimension_semantics = [#tpu.dimension_semantics<parallel>, #tpu.dimension_semantics<parallel>, #tpu.dimension_semantics<arbitrary>], iteration_bounds = array<i64: 1, 1, 1>, scalar_prefetch = 0 : i64, scratch_operands = 0 : i64, tpu.core_type = #tpu.core_type<tc>, window_params = [{transform_indices = @transform_0, window_bounds = array<i64: 8, 128>}, {transform_indices = @transform_1, window_bounds = array<i64: 128, 128>}, {transform_indices = @transform_2, window_bounds = array<i64: 1, 128>}, {transform_indices = @transform_3, window_bounds = array<i64: 8, 128>}]} {
    %c0 = arith.constant 0 : index
    %c0_0 = arith.constant 0 : index
    %0 = vector.load %arg3[%c0, %c0_0] : memref<8x128xf32, #tpu.memory_space<vmem>>, vector<8x128xf32>
    %c0_1 = arith.constant 0 : index
    %c0_2 = arith.constant 0 : index
    %1 = vector.load %arg4[%c0_1, %c0_2] : memref<128x128xf32, #tpu.memory_space<vmem>>, vector<128x128xf32>
    %cst = arith.constant dense<0.000000e+00> : vector<8x128xf32>
    %2 = tpu.matmul %0, %1, %cst {dimension_numbers = #tpu.dot_dimension_numbers<[1], [0], [0], [1], [0, 0, 1, 1], [], []>} : vector<8x128xf32>, vector<128x128xf32>, vector<8x128xf32> -> vector<8x128xf32>
    %c0_i32 = arith.constant 0 : i32
    %3 = arith.cmpi eq, %arg2, %c0_i32 : i32
    %4 = arith.extui %3 : i1 to i32
    %c0_i32_3 = arith.constant 0 : i32
    %5 = arith.cmpi ne, %4, %c0_i32_3 : i32
    scf.if %5 {
      %c0_6 = arith.constant 0 : index
      %c0_7 = arith.constant 0 : index
      %9 = vector.load %arg5[%c0_6, %c0_7] : memref<1x128xf32, #tpu.memory_space<vmem>>, vector<1x128xf32>
      %10 = vector.broadcast %9 : vector<1x128xf32> to vector<8x128xf32>
      %11 = arith.addf %2, %10 : vector<8x128xf32>
      %c0_8 = arith.constant 0 : index
      %c0_9 = arith.constant 0 : index
      %12 = vector.load %arg6[%c0_8, %c0_9] : memref<8x128xf32, #tpu.memory_space<vmem>>, vector<8x128xf32>
      tpu.vector_store %arg6[%c0_8, %c0_9], %11 {strides = array<i32>} : memref<8x128xf32, #tpu.memory_space<vmem>>, vector<8x128xf32>,
    } else {
    }
    %c0_i32_4 = arith.constant 0 : i32
    %6 = arith.cmpi ne, %arg2, %c0_i32_4 : i32
    %7 = arith.extui %6 : i1 to i32
    %c0_i32_5 = arith.constant 0 : i32
    %8 = arith.cmpi ne, %7, %c0_i32_5 : i32
    scf.if %8 {
      %c0_6 = arith.constant 0 : index
      %c0_7 = arith.constant 0 : index
      %9 = vector.load %arg6[%c0_6, %c0_7] : memref<8x128xf32, #tpu.memory_space<vmem>>, vector<8x128xf32>
      %10 = arith.addf %9, %2 : vector<8x128xf32>
      %c0_8 = arith.constant 0 : index
      %c0_9 = arith.constant 0 : index
      %11 = vector.load %arg6[%c0_8, %c0_9] : memref<8x128xf32, #tpu.memory_space<vmem>>, vector<8x128xf32>
      tpu.vector_store %arg6[%c0_8, %c0_9], %10 {strides = array<i32>} : memref<8x128xf32, #tpu.memory_space<vmem>>, vector<8x128xf32>,
    } else {
    }
    return
  }
  func.func @transform_0(%arg0: i32, %arg1: i32, %arg2: i32) -> (i32, i32) {
    %c0_i32 = arith.constant 0 : i32
    return %arg0, %arg2 : i32, i32
  }
  func.func @transform_1(%arg0: i32, %arg1: i32, %arg2: i32) -> (i32, i32) {
    %c0_i32 = arith.constant 0 : i32
    return %arg2, %arg1 : i32, i32
  }
  func.func @transform_2(%arg0: i32, %arg1: i32, %arg2: i32) -> (i32, i32) {
    %c0_i32 = arith.constant 0 : i32
    %c0_i32_0 = arith.constant 0 : i32
    return %c0_i32, %arg1 : i32, i32
  }
  func.func @transform_3(%arg0: i32, %arg1: i32, %arg2: i32) -> (i32, i32) {
    %c0_i32 = arith.constant 0 : i32
    return %arg0, %arg1 : i32, i32
  }
}

</mosaic_0001>

<bundles_post_ra>
// kernel: _linear_pallas.1
= control target key start
LH: loop header
LB: loop body
LE: loop exit
PB: predicated region body
PF: predicated region fallthrough
CT: control target
= control target key end

     0   :  { %8 = vsyncpa [#allocation3], 0  ;;  %s220_s12 = smov [#allocation2]   ;;  %s257_s0 = inlined_call_operand.vmem [shape: f32[8,128], index: 0, kind: input, shape index: {}]   ;;  %s258_s1 = inlined_call_operand.hbm [shape: f32[128,128], index: 1, kind: input, shape index: {}]   ;;  %s259_s2 = inlined_call_operand.vmem [shape: f32[1,128], index: 2, kind: input, shape index: {}]   ;;  %s260_s3 = inlined_call_operand.vmem [shape: f32[8,128], index: 3, kind: output, shape index: {}]  }
   0x1   :  { %s16_s13 = sshll.u32 %s220_s12, 4  ;;  %s17_s13 = int_to_ptr.vmem [resolvable:$true] %s16_s13 }
   0x2   :  { %s206_s14 = scalar_lea.vmem %s17_s13, 2048  ;;  %p211_p1 = scmp.lt.s32.totalorder %s17_s13, %s17_s13 }
   0x3   :  { %p207_p0 = scmp.ne.s32.totalorder %s17_s13, %s206_s14  ;;  %p212_p2 = scmp.lt.s32.totalorder %s206_s14, %s206_s14 }
   0x5   :  { %p213_p3 = por %p212_p2, %p211_p1 }
   0x7   :  { %p214_p4 = pnand %p213_p3, %p207_p0 }
   0x9   :  { %217 = shalt.err (!%p214_p4)
}
   0xa   :  { %s221_s15 = smov 128   ;;  %s222_s16 = smov 8  }
   0xb   :  { %22 = dma.hbm_to_vmem [thread:$0]  %s258_s1, 2048, %s17_s13, [#allocation3], %s221_s15, %s221_s15, %s222_s16  }
   0xc   :  { %218 = dma.done.wait [#allocation3], 2048  }
   0xd   :  { %219 = vsyncadd [#allocation3], 4294965248  ;;  %v223_v0 = vmov 0.0   ;;  %vm224_vm0 = vmmov 0   ;;  %v44_v1 = vld [vmem:[#allocation2 + $0x78] sm:$0xff]  ;;  %v43_v2 = vld [vmem:[#allocation2 + $0x70] sm:$0xff] }
   0xe   :  { %158 = vmatprep.subr.mxu0 %v223_v0  ;;  %190 = vmatprep.mubr.msk.f32.mxu0 %vm224_vm0, %v223_v0  ;;  %v42_v3 = vld [vmem:[#allocation2 + $0x68] sm:$0xff]  ;;  %v41_v4 = vld [vmem:[#allocation2 + $0x60] sm:$0xff]  ;;  %v40_v5 = vld [vmem:[#allocation2 + $0x58] sm:$0xff] }
   0xf   :  { %159 = vmatpush3.msra.mxu0 %v44_v1  ;;  %v39_v6 = vld [vmem:[#allocation2 + $0x50] sm:$0xff]  ;;  %v38_v7 = vld [vmem:[#allocation2 + $0x48] sm:$0xff]  ;;  %v37_v8 = vld [vmem:[#allocation2 + $0x40] sm:$0xff] }
  0x10   :  { %160 = vmatprep.subr.mxu0 %v223_v0  ;;  %v36_v9 = vld [vmem:[#allocation2 + $0x38] sm:$0xff]  ;;  %v35_v10 = vld [vmem:[#allocation2 + $0x30] sm:$0xff]  ;;  %v34_v11 = vld [vmem:[#allocation2 + $0x28] sm:$0xff] }
  0x11   :  { %161 = vmatpush3.msra.mxu0 %v43_v2  ;;  %v33_v12 = vld [vmem:[#allocation2 + $0x20] sm:$0xff]  ;;  %v32_v13 = vld [vmem:[#allocation2 + $0x18] sm:$0xff]  ;;  %v31_v14 = vld [vmem:[#allocation2 + $0x10] sm:$0xff] }
  0x12   :  { %162 = vmatprep.subr.mxu0 %v223_v0  ;;  %v30_v15 = vld [vmem:[#allocation2 + $0x8] sm:$0xff]  ;;  %v29_v16 = vld [vmem:[#allocation2] sm:$0xff] }
  0x13   :  { %163 = vmatpush3.msra.mxu0 %v42_v3  ;;  %v28_v17 = vld [vmem:[%s257_s0] sm:$0xff] }
  0x14   :  { %164 = vmatprep.subr.mxu0 %v223_v0  ;;  %v140_v18 = vld [vmem:[%s259_s2] ss:$0 sm:$0xff] }
  0x15   :  { %165 = vmatpush3.msra.mxu0 %v41_v4 }
  0x16   :  { %166 = vmatprep.subr.mxu0 %v223_v0 }
  0x17   :  { %167 = vmatpush3.msra.mxu0 %v40_v5 }
  0x18   :  { %168 = vmatprep.subr.mxu0 %v223_v0 }
  0x19   :  { %169 = vmatpush3.msra.mxu0 %v39_v6 }
  0x1a   :  { %170 = vmatprep.subr.mxu0 %v223_v0 }
  0x1b   :  { %171 = vmatpush3.msra.mxu0 %v38_v7 }
  0x1c   :  { %172 = vmatprep.subr.mxu0 %v223_v0 }
  0x1d   :  { %173 = vmatpush3.msra.mxu0 %v37_v8 }
  0x1e   :  { %174 = vmatprep.subr.mxu0 %v223_v0 }
  0x1f   :  { %175 = vmatpush3.msra.mxu0 %v36_v9 }
  0x20   :  { %176 = vmatprep.subr.mxu0 %v223_v0 }
  0x21   :  { %177 = vmatpush3.msra.mxu0 %v35_v10 }
  0x22   :  { %178 = vmatprep.subr.mxu0 %v223_v0 }
  0x23   :  { %179 = vmatpush3.msra.mxu0 %v34_v11 }
  0x24   :  { %180 = vmatprep.subr.mxu0 %v223_v0 }
  0x25   :  { %181 = vmatpush3.msra.mxu0 %v33_v12 }
  0x26   :  { %182 = vmatprep.subr.mxu0 %v223_v0 }
  0x27   :  { %183 = vmatpush3.msra.mxu0 %v32_v13 }
  0x28   :  { %184 = vmatprep.subr.mxu0 %v223_v0 }
  0x29   :  { %185 = vmatpush3.msra.mxu0 %v31_v14 }
  0x2a   :  { %186 = vmatprep.subr.mxu0 %v223_v0 }
  0x2b   :  { %187 = vmatpush3.msra.mxu0 %v30_v15 }
  0x2c   :  { %188 = vmatprep.subr.mxu0 %v223_v0 }
  0x2d   :  { %189 = vmatpush3.msra.mxu0 %v29_v16 }
  0x2e   :  { %191 = vmatmul.mubr.f32.vlgmr.msra.gmra.mxu0 %v28_v17 }
  0xee   :  { %v111_v19 = vpop.f32.mrf.mxu0 }
  0xef   :  { %v126_v20 = vadd.f32 %v140_v18, %v111_v19 }
  0xf0   :  { %v192_v21 = vpop.f32.mrf.mxu0 }
  0xf1   :  { %127 = vst [vmem:[%s260_s3] sm:$0xff] %v126_v20 }
  0xf2   :  { %139 = vsyncpa [#allocation3], 1 }

</bundles_post_ra>
